<compile_context>
chip_gen: v5e
topology: v5e:2x2
jax: 0.10.0
libtpu: 0.0.40
codegen_flags: <defaults>
</compile_context>

<pallas_src>
import functools

import jax
import jax.numpy as jnp
from jax.experimental import pallas as pl
from jax.experimental.pallas import tpu as pltpu


# -----------------------------------------------------------------------------
# Kernel
# -----------------------------------------------------------------------------
def _linear_kernel(x_ref, w_ref, b_ref, s_ref, o_ref, acc_ref):
    """One (B, tn) output tile; reduces over K along grid axis 1 (last).

    w_ref is a (1, 1, tk, tn) contiguous pre-tiled weight block, possibly in a
    narrow dtype (int8 / fp8); it is dequantized to the activation dtype on the
    VPU before hitting the MXU.  Per-output-channel scales (s_ref, ones for
    float weights) and the bias are folded into the k==last finalize.
    """
    k = pl.program_id(1)

    @pl.when(k == 0)
    def _():
        acc_ref[...] = jnp.zeros_like(acc_ref)

    x_blk = x_ref[...]
    w_blk = w_ref[0, 0].astype(x_blk.dtype)            # no-op for float weights
    acc_ref[...] += jnp.dot(x_blk, w_blk, preferred_element_type=jnp.float32)

    @pl.when(k == pl.num_programs(1) - 1)
    def _():
        o_ref[...] = (acc_ref[...] * s_ref[...] + b_ref[...]).astype(o_ref.dtype)


# -----------------------------------------------------------------------------
# Helpers
# -----------------------------------------------------------------------------
@functools.lru_cache(maxsize=1)
def _vmem_capacity_bytes():
    """Per-core VMEM capacity; conservative 64 MiB fallback (v7x per-TC)."""
    try:
        cap = int(pltpu.get_tpu_info().vmem_capacity_bytes)
        if cap > 0:
            return cap
    except Exception:
        pass
    return 64 * 1024 * 1024


def _pick_tn(N, out_dim):
    """Lane-dense tn dividing N; prefer out_dim (1408 for the real module)."""
    if out_dim % 128 == 0 and N % out_dim == 0 and out_dim <= 4096:
        return out_dim
    best = None
    for m in range(1, N // 128 + 1):
        tn = m * 128
        if N % tn == 0 and tn <= 4096:
            best = tn
    return best if best is not None else N          # tn == N (full dim) is legal


def _pick_tk(K, tn, w_bytes, weight_budget_bytes, buffers):
    """Largest multiple-of-128 divisor of K whose buffered weight tiles fit."""
    best = None
    for m in range(1, K // 128 + 1):
        tk = m * 128
        if K % tk == 0 and buffers * tk * tn * w_bytes <= weight_budget_bytes:
            best = tk
    return best if best is not None else K          # tk == K (full dim) is legal


def pretile_weight(w_t, tk, tn):
    """One-time HBM re-layout: (K, N) -> (N//tn, K//tk, tk, tn) contiguous tiles.

    Do this offline / once per weight; doing it per-call would transiently
    double weight HBM footprint for the real module.
    """
    K, N = w_t.shape
    assert K % tk == 0 and N % tn == 0
    return w_t.reshape(K // tk, tk, N // tn, tn).transpose(2, 0, 1, 3)


def quantize_weight(w_t, dtype=jnp.int8):
    """Symmetric per-output-channel quantization: (K, N) -> (w_q, scale(1, N)).

    int8 for v5e/v6e (int-native MXU), fp8 (e.g. jnp.float8_e4m3fn) for v7x.
    The kernel dequantizes tiles to the activation dtype on the VPU, so either
    container works on any generation.
    """
    w_f32 = w_t.astype(jnp.float32)
    absmax = jnp.maximum(jnp.max(jnp.abs(w_f32), axis=0, keepdims=True), 1e-12)
    if jnp.issubdtype(dtype, jnp.integer):
        qmax = float(jnp.iinfo(dtype).max)
        scale = absmax / qmax
        w_q = jnp.clip(jnp.round(w_f32 / scale), -qmax, qmax).astype(dtype)
    else:  # fp8
        qmax = float(jnp.finfo(dtype).max)
        scale = absmax / qmax
        w_q = (w_f32 / scale).astype(dtype)
    return w_q, scale.astype(jnp.float32)


# -----------------------------------------------------------------------------
# Wrapper
# -----------------------------------------------------------------------------
@functools.partial(
    jax.jit,
    static_argnames=(
        "out_seq", "out_dim", "tn", "tk", "weight_buffers", "weight_budget_bytes",
    ),
)
def linear_transformation(
    x, w, bias, scale=None, *, out_seq, out_dim,
    tn=None, tk=None, weight_buffers=2, weight_budget_bytes=None,
):
    """Flatten(1) -> Linear -> Unflatten(1, (out_seq, out_dim)).

    x     : (B, S_in, D_in)
    w     : (K, N) pre-transposed weight, or (N//tn, K//tk, tk, tn) pre-tiled
            (see pretile_weight).  dtype may be f32/bf16, or int8/fp8 (pass
            `scale` from quantize_weight).
    bias  : (N,)
    scale : optional (1, N) or (N,) per-output-channel dequant scale.
    """
    B = x.shape[0]
    out_dtype = x.dtype
    x_flat = x.reshape(B, -1)                          # nn.Flatten(1)
    K = x_flat.shape[1]
    N = out_seq * out_dim
    assert bias.shape == (N,)

    vmem_cap = _vmem_capacity_bytes()
    if weight_budget_bytes is None:
        weight_budget_bytes = int(0.55 * vmem_cap)     # generation-aware budget

    w_bytes = w.dtype.itemsize

    # ---- weight tiling ------------------------------------------------------
    if w.ndim == 4:                                    # pre-tiled (production)
        nb, kb, tk, tn = w.shape
        assert nb * tn == N and kb * tk == K
        w_tiled = w
    else:                                              # 2-D (K, N): tile here
        assert w.shape == (K, N)
        if tn is None:
            tn = _pick_tn(N, out_dim)
        if tk is None:
            tk = _pick_tk(K, tn, w_bytes, weight_budget_bytes, weight_buffers)
        assert N % tn == 0 and K % tk == 0
        w_tiled = pretile_weight(w, tk, tn)
    assert (tn % 128 == 0) or (tn == N)
    assert (tk % 128 == 0) or (tk == K)

    # ---- compute dtype: dequantize narrow weights to bf16 in-kernel ---------
    if w_bytes == 1:                                   # int8 / fp8 container
        compute_dtype = jnp.bfloat16
    else:
        compute_dtype = w.dtype
    x_flat = x_flat.astype(compute_dtype)

    bias2d = bias.reshape(1, N).astype(jnp.float32)
    if scale is None:
        scale2d = jnp.ones((1, N), jnp.float32)
    else:
        scale2d = scale.reshape(1, N).astype(jnp.float32)

    # ---- VMEM budget (per TensorCore) ---------------------------------------
    needed_vmem = (
        weight_buffers * tk * tn * w_bytes             # weight tile buffers
        + 2 * B * tk * x_flat.dtype.itemsize           # x chunk double-buffer
        + 2 * B * tn * out_dtype.itemsize              # output double-buffer
        + 2 * tn * 4 * 2                               # bias + scale (f32)
        + B * tn * 4                                   # f32 accumulator
    )
    vmem_limit = min(needed_vmem + (4 << 20), vmem_cap)

    cost = pl.CostEstimate(
        flops=2 * B * K * N,
        transcendentals=0,
        bytes_accessed=(
            K * N * w_bytes
            + (N // tn) * B * K * x_flat.dtype.itemsize
            + B * N * out_dtype.itemsize
            + 2 * N * 4
        ),
    )

    w_spec_kwargs = {}
    if weight_buffers != 2:
        # Only worth it if profiling shows a DMA-issue gap at step boundaries.
        w_spec_kwargs = dict(pipeline_mode=pl.Buffered(weight_buffers))

    y = pl.pallas_call(
        _linear_kernel,
        out_shape=jax.ShapeDtypeStruct((B, N), out_dtype),
        grid_spec=pltpu.PrefetchScalarGridSpec(
            num_scalar_prefetch=0,
            grid=(N // tn, K // tk),
            in_specs=[
                # Activation K-chunk (tiny at B=2; DMA fully hidden).
                pl.BlockSpec((B, tk), lambda j, k: (0, k)),
                # Contiguous pre-tiled weight slab: the only real HBM stream.
                pl.BlockSpec((1, 1, tk, tn), lambda j, k: (j, k, 0, 0),
                             **w_spec_kwargs),
                # Bias and per-channel dequant scale for the current N tile.
                pl.BlockSpec((1, tn), lambda j, k: (0, j)),
                pl.BlockSpec((1, tn), lambda j, k: (0, j)),
            ],
            out_specs=pl.BlockSpec((B, tn), lambda j, k: (0, j)),
            scratch_shapes=[pltpu.VMEM((B, tn), jnp.float32)],
        ),
        compiler_params=pltpu.CompilerParams(
            dimension_semantics=("parallel", "arbitrary"),
            vmem_limit_bytes=vmem_limit,
        ),
        cost_estimate=cost,
    )(x_flat, w_tiled, bias2d, scale2d)

    return y.reshape(B, out_seq, out_dim)              # nn.Unflatten(1, (...))


def make_params(key, in_features, out_features, dtype=jnp.float32):
    """nn.Linear-style init: U(-1/sqrt(fan_in), 1/sqrt(fan_in)); weight returned
    pre-transposed to (in_features, out_features)."""
    kw, kb = jax.random.split(key)
    bound = 1.0 / jnp.sqrt(jnp.float32(in_features))
    w_t = jax.random.uniform(kw, (in_features, out_features), jnp.float32,
                             minval=-bound, maxval=bound).astype(dtype)
    b = jax.random.uniform(kb, (out_features,), jnp.float32,
                           minval=-bound, maxval=bound)
    return w_t, b


if __name__ == "__main__":
    # Real module: S_IN, D_IN, S_OUT, D_OUT = 32, 768, 257, 1408 (~8.9B params).
    # Scaled-down, structurally identical instance for this test:
    B, S_IN, D_IN = 2, 8, 128        # x: (2, 8, 128) -> flatten -> (2, 1024)
    S_OUT, D_OUT = 16, 256           # linear -> (2, 4096) -> (2, 16, 256)
    K, N = S_IN * D_IN, S_OUT * D_OUT

    key = jax.random.PRNGKey(0)
    kx, kp = jax.random.split(key)
    x = jax.random.normal(kx, (B, S_IN, D_IN), dtype=jnp.float32)
    w_t, bias = make_params(kp, K, N, dtype=jnp.float32)
    x_flat = x.reshape(B, K)

    # --- 1) f32 weights, 2-D layout (auto tile sizes): tight tolerance -------
    out = jax.block_until_ready(
        linear_transformation(x, w_t, bias, out_seq=S_OUT, out_dim=D_OUT))
    ref = (x_flat @ w_t + bias).reshape(B, S_OUT, D_OUT)
    assert out.shape == (B, S_OUT, D_OUT)
    assert jnp.allclose(out, ref, atol=1e-4, rtol=1e-4)

    # --- 2) bf16 weights, pre-tiled contiguous layout (multi-chunk K) --------
    w_bf16 = w_t.astype(jnp.bfloat16)
    w_bf16_tiled = pretile_weight(w_bf16, tk=512, tn=256)
    out_bf16 = jax.block_until_ready(
        linear_transformation(x, w_bf16_tiled, bias, out_seq=S_OUT, out_dim=D_OUT))
    ref_bf16 = (jnp.dot(x_flat.astype(jnp.bfloat16), w_bf16,
                        preferred_element_type=jnp.float32)
                + bias).reshape(B, S_OUT, D_OUT)
    assert jnp.allclose(out_bf16, ref_bf16.astype(out_bf16.dtype),
                        atol=5e-2, rtol=5e-2)

    # --- 3) int8 weights + per-channel scales (quantized production path) ----
    w_q, scale = quantize_weight(w_t, jnp.int8)
    w_q_tiled = pretile_weight(w_q, tk=256, tn=512)
    out_q = jax.block_until_ready(
        linear_transformation(x, w_q_tiled, bias, scale,
                              out_seq=S_OUT, out_dim=D_OUT))
    ref_q = (jnp.dot(x_flat.astype(jnp.bfloat16), w_q.astype(jnp.bfloat16),
                     preferred_element_type=jnp.float32) * scale
             + bias).reshape(B, S_OUT, D_OUT)
    assert out_q.shape == (B, S_OUT, D_OUT)
    assert jnp.allclose(out_q, ref_q.astype(out_q.dtype), atol=5e-2, rtol=5e-2)

    print("KERNEL_OK")
</pallas_src>

<mosaic_0001>
module attributes {stable_mosaic.version = 11 : i64} {
  func.func @_linear_kernel(%arg0: i32, %arg1: i32, %arg2: memref<2x1024xf32, #tpu.memory_space<vmem>>, %arg3: memref<1x1x1024x256xf32, #tpu.memory_space<vmem>>, %arg4: memref<1x256xf32, #tpu.memory_space<vmem>>, %arg5: memref<1x256xf32, #tpu.memory_space<vmem>>, %arg6: memref<2x256xf32, #tpu.memory_space<vmem>>, %arg7: memref<2x256xf32, #tpu.memory_space<vmem>>) attributes {dimension_semantics = [#tpu.dimension_semantics<parallel>, #tpu.dimension_semantics<arbitrary>], iteration_bounds = array<i64: 16, 1>, scalar_prefetch = 0 : i64, scratch_operands = 1 : i64, tpu.core_type = #tpu.core_type<tc>, window_params = [{transform_indices = @transform_0, window_bounds = array<i64: 2, 1024>}, {transform_indices = @transform_1, window_bounds = array<i64: 1, 1, 1024, 256>}, {transform_indices = @transform_2, window_bounds = array<i64: 1, 256>}, {transform_indices = @transform_3, window_bounds = array<i64: 1, 256>}, {transform_indices = @transform_4, window_bounds = array<i64: 2, 256>}]} {
    %c0_i32 = arith.constant 0 : i32
    %0 = arith.cmpi eq, %arg1, %c0_i32 : i32
    %1 = arith.extui %0 : i1 to i32
    %c0_i32_0 = arith.constant 0 : i32
    %2 = arith.cmpi ne, %1, %c0_i32_0 : i32
    scf.if %2 {
      %cst_12 = arith.constant 0.000000e+00 : f32
      %13 = vector.broadcast %cst_12 : f32 to vector<2x256xf32>
      %c0_13 = arith.constant 0 : index
      %c0_14 = arith.constant 0 : index
      %14 = vector.load %arg7[%c0_13, %c0_14] : memref<2x256xf32, #tpu.memory_space<vmem>>, vector<2x256xf32>
      tpu.vector_store %arg7[%c0_13, %c0_14], %13 {strides = array<i32>} : memref<2x256xf32, #tpu.memory_space<vmem>>, vector<2x256xf32>,
    } else {
    }
    %c0 = arith.constant 0 : index
    %c0_1 = arith.constant 0 : index
    %3 = vector.load %arg2[%c0, %c0_1] : memref<2x1024xf32, #tpu.memory_space<vmem>>, vector<2x1024xf32>
    %c0_2 = arith.constant 0 : index
    %c0_3 = arith.constant 0 : index
    %c0_4 = arith.constant 0 : index
    %c0_5 = arith.constant 0 : index
    %4 = vector.load %arg3[%c0_2, %c0_3, %c0_4, %c0_5] : memref<1x1x1024x256xf32, #tpu.memory_space<vmem>>, vector<1x1x1024x256xf32>
    %5 = vector.shape_cast %4 : vector<1x1x1024x256xf32> to vector<1024x256xf32>
    %c0_6 = arith.constant 0 : index
    %c0_7 = arith.constant 0 : index
    %6 = vector.load %arg7[%c0_6, %c0_7] : memref<2x256xf32, #tpu.memory_space<vmem>>, vector<2x256xf32>
    %cst = arith.constant dense<0.000000e+00> : vector<2x256xf32>
    %7 = tpu.matmul %3, %5, %cst {dimension_numbers = #tpu.dot_dimension_numbers<[1], [0], [0], [1], [0, 0, 1, 1], [], []>} : vector<2x1024xf32>, vector<1024x256xf32>, vector<2x256xf32> -> vector<2x256xf32>
    %8 = arith.addf %6, %7 : vector<2x256xf32>
    %c0_8 = arith.constant 0 : index
    %c0_9 = arith.constant 0 : index
    %9 = vector.load %arg7[%c0_8, %c0_9] : memref<2x256xf32, #tpu.memory_space<vmem>>, vector<2x256xf32>
    tpu.vector_store %arg7[%c0_8, %c0_9], %8 {strides = array<i32>} : memref<2x256xf32, #tpu.memory_space<vmem>>, vector<2x256xf32>,
    %c0_i32_10 = arith.constant 0 : i32
    %10 = arith.cmpi eq, %arg1, %c0_i32_10 : i32
    %11 = arith.extui %10 : i1 to i32
    %c0_i32_11 = arith.constant 0 : i32
    %12 = arith.cmpi ne, %11, %c0_i32_11 : i32
    scf.if %12 {
      %c0_12 = arith.constant 0 : index
      %c0_13 = arith.constant 0 : index
      %13 = vector.load %arg7[%c0_12, %c0_13] : memref<2x256xf32, #tpu.memory_space<vmem>>, vector<2x256xf32>
      %c0_14 = arith.constant 0 : index
      %c0_15 = arith.constant 0 : index
      %14 = vector.load %arg5[%c0_14, %c0_15] : memref<1x256xf32, #tpu.memory_space<vmem>>, vector<1x256xf32>
      %15 = vector.broadcast %14 : vector<1x256xf32> to vector<2x256xf32>
      %16 = arith.mulf %13, %15 : vector<2x256xf32>
      %c0_16 = arith.constant 0 : index
      %c0_17 = arith.constant 0 : index
      %17 = vector.load %arg4[%c0_16, %c0_17] : memref<1x256xf32, #tpu.memory_space<vmem>>, vector<1x256xf32>
      %18 = vector.broadcast %17 : vector<1x256xf32> to vector<2x256xf32>
      %19 = arith.addf %16, %18 : vector<2x256xf32>
      %c0_18 = arith.constant 0 : index
      %c0_19 = arith.constant 0 : index
      %20 = vector.load %arg6[%c0_18, %c0_19] : memref<2x256xf32, #tpu.memory_space<vmem>>, vector<2x256xf32>
      tpu.vector_store %arg6[%c0_18, %c0_19], %19 {strides = array<i32>} : memref<2x256xf32, #tpu.memory_space<vmem>>, vector<2x256xf32>,
    } else {
    }
    return
  }
  func.func @transform_0(%arg0: i32, %arg1: i32) -> (i32, i32) {
    %c0_i32 = arith.constant 0 : i32
    %c0_i32_0 = arith.constant 0 : i32
    return %c0_i32, %arg1 : i32, i32
  }
  func.func @transform_1(%arg0: i32, %arg1: i32) -> (i32, i32, i32, i32) {
    %c0_i32 = arith.constant 0 : i32
    %c0_i32_0 = arith.constant 0 : i32
    %c0_i32_1 = arith.constant 0 : i32
    return %arg0, %arg1, %c0_i32, %c0_i32_0 : i32, i32, i32, i32
  }
  func.func @transform_2(%arg0: i32, %arg1: i32) -> (i32, i32) {
    %c0_i32 = arith.constant 0 : i32
    %c0_i32_0 = arith.constant 0 : i32
    return %c0_i32, %arg0 : i32, i32
  }
  func.func @transform_3(%arg0: i32, %arg1: i32) -> (i32, i32) {
    %c0_i32 = arith.constant 0 : i32
    %c0_i32_0 = arith.constant 0 : i32
    return %c0_i32, %arg0 : i32, i32
  }
  func.func @transform_4(%arg0: i32, %arg1: i32) -> (i32, i32) {
    %c0_i32 = arith.constant 0 : i32
    %c0_i32_0 = arith.constant 0 : i32
    return %c0_i32, %arg0 : i32, i32
  }
}

</mosaic_0001>

<bundles_post_ra>
// kernel: linear_transformation.1
= control target key start
LH: loop header
LB: loop body
LE: loop exit
PB: predicated region body
PF: predicated region fallthrough
CT: control target
= control target key end

     0   :  { %s1116_s15 = smov 0   ;;  %s1118_s16 = smov 0   ;;  %s1464_s0 = inlined_call_operand.vmem [shape: f32[2,1024], index: 0, kind: input, shape index: {}]   ;;  %s1465_s1 = inlined_call_operand.vmem [shape: f32[16,1,1024,256], index: 1, kind: input, shape index: {}]   ;;  %s1466_s2 = inlined_call_operand.vmem [shape: f32[1,4096], index: 2, kind: input, shape index: {}]   ;;  %s1467_s3 = inlined_call_operand.vmem [shape: f32[1,4096], index: 3, kind: input, shape index: {}]   ;;  %s1468_s4 = inlined_call_operand.vmem [shape: f32[2,4096], index: 4, kind: output, shape index: {}]  }
   0x1   :  { %s1120_s17 = smov 0  }
   0x2 LB: > { %s26_s18 = sadd.s32 1, %s1084_s16  ;;  %p1031_p0 = scmp.ge.s32.totalorder %s1088_s17, 1  ;;  %s1088_s17 = sphi %s1120_s17, %s14_s17   ;;  %s1084_s16 = sphi %s1118_s16, %s1470_s16   ;;  %s1080_s15 = sphi %s1116_s15, %s1469_s15  }
   0x3   : > { %p28_p1 = scmp.ge.s32.totalorder %s26_s18, 16  ;;  %p211_p2 = scmp.lt.s32.totalorder %s1088_s17, 17 }
   0x5   : > { %s1472_s18 = smov (%p28_p1, %s26_s18), 0  ;;  %p212_p3 = pnand %p1031_p0, %p211_p2 }
   0x6   : > { %p260_p4 = scmp.lt.s32.totalorder (!%p212_p3), %s1080_s15, 15  ;;  %s1034_s28 = sshll.u32 (!%p212_p3), %s1080_s15, 1 }
   0x7   : > { %215 = sbr.rel (%p212_p3) target bundleno = 305 (0x131), region = 36  ;;  %p270_p5 = scmp.lt.s32.totalorder (!%p212_p3), %s1034_s28, 31 }
   0xc   : > { %s261_s19 = scalar_select %p260_p4, %s1080_s15, 15  ;;  %vm893_vm0 = vcmask 1041408  }
   0xd   : > { %s1474_s28 = smov (!%p270_p5, %s1034_s28), 31 }
   0xe   : > { %s1040_s20 = sshll.u32 %s261_s19, 11  ;;  %s277_s5 = scalar_lea.vmem %s1467_s3, %s1474_s28 }
   0xf   : > { %s1141_s23 = scalar_lea.vmem %s1465_s1, %s1040_s20  ;;  %s272_s8 = scalar_lea.vmem %s1466_s2, %s1474_s28 }
  0x10   : > { %v322_v0 = vld [vmem:[%s1141_s23 + $0xf0] sm:$0xff]  ;;  %v320_v2 = vld [vmem:[%s1141_s23 + $0xe0] sm:$0xff]  ;;  %s1037_s9 = sshll.u32 %s1474_s28, 1 }
  0x11   : > { %v386_v1 = vld [vmem:[%s1141_s23 + $0x2f0] sm:$0xff]  ;;  %570 = vmatpush.msra.mxu0 %v322_v0  ;;  %v384_v4 = vld [vmem:[%s1141_s23 + $0x2e0] sm:$0xff]  ;;  %s283_s12 = scalar_lea.vmem %s1468_s4, %s1037_s9 }
  0x12   : > { %610 = vmatpush.msra.mxu2 %v386_v1  ;;  %v354_v3 = vld [vmem:[%s1141_s23 + $0x1f0] sm:$0xff]  ;;  %v352_v7 = vld [vmem:[%s1141_s23 + $0x1e0] sm:$0xff] }
  0x13   : > { %v418_v5 = vld [vmem:[%s1141_s23 + $0x3f0] sm:$0xff]  ;;  %590 = vmatpush.msra.mxu1 %v354_v3  ;;  %571 = vmatpush.msra.mxu0 %v320_v2  ;;  %v416_v9 = vld [vmem:[%s1141_s23 + $0x3e0] sm:$0xff] }
  0x14   : > { %630 = vmatpush.msra.mxu3 %v418_v5  ;;  %v318_v6 = vld [vmem:[%s1141_s23 + $0xd0] sm:$0xff]  ;;  %611 = vmatpush.msra.mxu2 %v384_v4  ;;  %v316_v11 = vld [vmem:[%s1141_s23 + $0xc0] sm:$0xff] }
  0x15   : > { %v382_v8 = vld [vmem:[%s1141_s23 + $0x2d0] sm:$0xff]  ;;  %591 = vmatpush.msra.mxu1 %v352_v7  ;;  %v380_v12 = vld [vmem:[%s1141_s23 + $0x2c0] sm:$0xff]  ;;  %572 = vmatpush.msra.mxu0 %v318_v6 }
  0x16   : > { %v350_v10 = vld [vmem:[%s1141_s23 + $0x1d0] sm:$0xff]  ;;  %631 = vmatpush.msra.mxu3 %v416_v9  ;;  %612 = vmatpush.msra.mxu2 %v382_v8  ;;  %v348_v14 = vld [vmem:[%s1141_s23 + $0x1c0] sm:$0xff] }
  0x17   : > { %v414_v13 = vld [vmem:[%s1141_s23 + $0x3d0] sm:$0xff]  ;;  %v412_v15 = vld [vmem:[%s1141_s23 + $0x3c0] sm:$0xff]  ;;  %592 = vmatpush.msra.mxu1 %v350_v10  ;;  %573 = vmatpush.msra.mxu0 %v316_v11 }
  0x18   : > { %632 = vmatpush.msra.mxu3 %v414_v13  ;;  %v314_v16 = vld [vmem:[%s1141_s23 + $0xb0] sm:$0xff]  ;;  %613 = vmatpush.msra.mxu2 %v380_v12  ;;  %v312_v20 = vld [vmem:[%s1141_s23 + $0xa0] sm:$0xff] }
  0x19   : > { %v378_v17 = vld [vmem:[%s1141_s23 + $0x2b0] sm:$0xff]  ;;  %593 = vmatpush.msra.mxu1 %v348_v14  ;;  %v376_v21 = vld [vmem:[%s1141_s23 + $0x2a0] sm:$0xff]  ;;  %574 = vmatpush.msra.mxu0 %v314_v16 }
  0x1a   : > { %v346_v18 = vld [vmem:[%s1141_s23 + $0x1b0] sm:$0xff]  ;;  %633 = vmatpush.msra.mxu3 %v412_v15  ;;  %614 = vmatpush.msra.mxu2 %v378_v17  ;;  %v344_v22 = vld [vmem:[%s1141_s23 + $0x1a0] sm:$0xff] }
  0x1b   : > { %v410_v19 = vld [vmem:[%s1141_s23 + $0x3b0] sm:$0xff]  ;;  %v408_v23 = vld [vmem:[%s1141_s23 + $0x3a0] sm:$0xff]  ;;  %594 = vmatpush.msra.mxu1 %v346_v18  ;;  %575 = vmatpush.msra.mxu0 %v312_v20 }
  0x1c   : > { %634 = vmatpush.msra.mxu3 %v410_v19  ;;  %v310_v24 = vld [vmem:[%s1141_s23 + $0x90] sm:$0xff]  ;;  %615 = vmatpush.msra.mxu2 %v376_v21  ;;  %v308_v28 = vld [vmem:[%s1141_s23 + $0x80] sm:$0xff] }
  0x1d   : > { %v374_v25 = vld [vmem:[%s1141_s23 + $0x290] sm:$0xff]  ;;  %595 = vmatpush.msra.mxu1 %v344_v22  ;;  %v372_v29 = vld [vmem:[%s1141_s23 + $0x280] sm:$0xff]  ;;  %576 = vmatpush.msra.mxu0 %v310_v24 }
  0x1e   : > { %v342_v26 = vld [vmem:[%s1141_s23 + $0x190] sm:$0xff]  ;;  %635 = vmatpush.msra.mxu3 %v408_v23  ;;  %616 = vmatpush.msra.mxu2 %v374_v25  ;;  %v340_v30 = vld [vmem:[%s1141_s23 + $0x180] sm:$0xff] }
  0x1f   : > { %v406_v27 = vld [vmem:[%s1141_s23 + $0x390] sm:$0xff]  ;;  %v404_v31 = vld [vmem:[%s1141_s23 + $0x380] sm:$0xff]  ;;  %596 = vmatpush.msra.mxu1 %v342_v26  ;;  %577 = vmatpush.msra.mxu0 %v308_v28 }
  0x20   : > { %636 = vmatpush.msra.mxu3 %v406_v27  ;;  %v306_v32 = vld [vmem:[%s1141_s23 + $0x70] sm:$0xff]  ;;  %617 = vmatpush.msra.mxu2 %v372_v29  ;;  %v304_v36 = vld [vmem:[%s1141_s23 + $0x60] sm:$0xff] }
  0x21   : > { %v370_v33 = vld [vmem:[%s1141_s23 + $0x270] sm:$0xff]  ;;  %597 = vmatpush.msra.mxu1 %v340_v30  ;;  %v368_v37 = vld [vmem:[%s1141_s23 + $0x260] sm:$0xff]  ;;  %578 = vmatpush.msra.mxu0 %v306_v32 }
  0x22   : > { %v338_v34 = vld [vmem:[%s1141_s23 + $0x170] sm:$0xff]  ;;  %637 = vmatpush.msra.mxu3 %v404_v31  ;;  %618 = vmatpush.msra.mxu2 %v370_v33  ;;  %v336_v38 = vld [vmem:[%s1141_s23 + $0x160] sm:$0xff] }
  0x23   : > { %v402_v35 = vld [vmem:[%s1141_s23 + $0x370] sm:$0xff]  ;;  %v400_v39 = vld [vmem:[%s1141_s23 + $0x360] sm:$0xff]  ;;  %598 = vmatpush.msra.mxu1 %v338_v34  ;;  %579 = vmatpush.msra.mxu0 %v304_v36 }
  0x24   : > { %638 = vmatpush.msra.mxu3 %v402_v35  ;;  %v302_v40 = vld [vmem:[%s1141_s23 + $0x50] sm:$0xff]  ;;  %619 = vmatpush.msra.mxu2 %v368_v37  ;;  %v300_v44 = vld [vmem:[%s1141_s23 + $0x40] sm:$0xff]  ;;  %v291_v35 = vld [vmem:[%s1464_s0 + $0x8] sm:$0xff] }
  0x25   : > { %v366_v41 = vld [vmem:[%s1141_s23 + $0x250] sm:$0xff]  ;;  %599 = vmatpush.msra.mxu1 %v336_v38  ;;  %v364_v45 = vld [vmem:[%s1141_s23 + $0x240] sm:$0xff]  ;;  %580 = vmatpush.msra.mxu0 %v302_v40  ;;  %553 = vst [vmem:[#allocation1 + $0x20] ss:$4 sm:$0xff] %v291_v35  ;;  %v409_v35 = vld [vmem:[%s1141_s23 + $0x3a8] sm:$0xff] }
  0x26   : > { %v334_v42 = vld [vmem:[%s1141_s23 + $0x150] sm:$0xff]  ;;  %639 = vmatpush.msra.mxu3 %v400_v39  ;;  %620 = vmatpush.msra.mxu2 %v366_v41  ;;  %v332_v46 = vld [vmem:[%s1141_s23 + $0x140] sm:$0xff] }
  0x27   : > { %v398_v43 = vld [vmem:[%s1141_s23 + $0x350] sm:$0xff]  ;;  %v396_v47 = vld [vmem:[%s1141_s23 + $0x340] sm:$0xff]  ;;  %600 = vmatpush.msra.mxu1 %v334_v42  ;;  %581 = vmatpush.msra.mxu0 %v300_v44 }
  0x28   : > { %640 = vmatpush.msra.mxu3 %v398_v43  ;;  %v298_v48 = vld [vmem:[%s1141_s23 + $0x30] sm:$0xff]  ;;  %621 = vmatpush.msra.mxu2 %v364_v45  ;;  %v296_v52 = vld [vmem:[%s1141_s23 + $0x20] sm:$0xff] }
  0x29   : > { %v362_v49 = vld [vmem:[%s1141_s23 + $0x230] sm:$0xff]  ;;  %601 = vmatpush.msra.mxu1 %v332_v46  ;;  %v360_v53 = vld [vmem:[%s1141_s23 + $0x220] sm:$0xff]  ;;  %582 = vmatpush.msra.mxu0 %v298_v48 }
  0x2a   : > { %v330_v50 = vld [vmem:[%s1141_s23 + $0x130] sm:$0xff]  ;;  %641 = vmatpush.msra.mxu3 %v396_v47  ;;  %622 = vmatpush.msra.mxu2 %v362_v49  ;;  %v328_v54 = vld [vmem:[%s1141_s23 + $0x120] sm:$0xff] }
  0x2b   : > { %v394_v51 = vld [vmem:[%s1141_s23 + $0x330] sm:$0xff]  ;;  %v392_v55 = vld [vmem:[%s1141_s23 + $0x320] sm:$0xff]  ;;  %602 = vmatpush.msra.mxu1 %v330_v50  ;;  %583 = vmatpush.msra.mxu0 %v296_v52 }
  0x2c   : > { %642 = vmatpush.msra.mxu3 %v394_v51  ;;  %v294_v56 = vld [vmem:[%s1141_s23 + $0x10] sm:$0xff]  ;;  %623 = vmatpush.msra.mxu2 %v360_v53  ;;  %v292_v60 = vld [vmem:[%s1141_s23] sm:$0xff] }
  0x2d   : > { %v358_v57 = vld [vmem:[%s1141_s23 + $0x210] sm:$0xff]  ;;  %603 = vmatpush.msra.mxu1 %v328_v54  ;;  %v356_v61 = vld [vmem:[%s1141_s23 + $0x200] sm:$0xff]  ;;  %584 = vmatpush.msra.mxu0 %v294_v56 }
  0x2e   : > { %v326_v58 = vld [vmem:[%s1141_s23 + $0x110] sm:$0xff]  ;;  %643 = vmatpush.msra.mxu3 %v392_v55  ;;  %624 = vmatpush.msra.mxu2 %v358_v57  ;;  %v324_v0 = vld [vmem:[%s1141_s23 + $0x100] sm:$0xff] }
  0x2f   : > { %v390_v59 = vld [vmem:[%s1141_s23 + $0x310] sm:$0xff]  ;;  %604 = vmatpush.msra.mxu1 %v326_v58  ;;  %v388_v1 = vld [vmem:[%s1141_s23 + $0x300] sm:$0xff]  ;;  %585 = vmatpush.msra.mxu0 %v292_v60 }
  0x30   : > { %v450_v62 = vld [vmem:[%s1141_s23 + $0x4f0] sm:$0xff]  ;;  %644 = vmatpush.msra.mxu3 %v390_v59  ;;  %625 = vmatpush.msra.mxu2 %v356_v61  ;;  %v448_v2 = vld [vmem:[%s1141_s23 + $0x4e0] sm:$0xff] }
  0x31   : > { %v514_v63 = vld [vmem:[%s1141_s23 + $0x6f0] sm:$0xff]  ;;  %650 = vmatpush.msrb.mxu0 %v450_v62  ;;  %v512_v4 = vld [vmem:[%s1141_s23 + $0x6e0] sm:$0xff]  ;;  %605 = vmatpush.msra.mxu1 %v324_v0 }
  0x32   : > { %v482_v3 = vld [vmem:[%s1141_s23 + $0x5f0] sm:$0xff]  ;;  %690 = vmatpush.msrb.mxu2 %v514_v63  ;;  %645 = vmatpush.msra.mxu3 %v388_v1  ;;  %v480_v7 = vld [vmem:[%s1141_s23 + $0x5e0] sm:$0xff] }
  0x33   : > { %v546_v5 = vld [vmem:[%s1141_s23 + $0x7f0] sm:$0xff]  ;;  %651 = vmatpush.msrb.mxu0 %v448_v2  ;;  %670 = vmatpush.msrb.mxu1 %v482_v3  ;;  %v544_v9 = vld [vmem:[%s1141_s23 + $0x7e0] sm:$0xff]  ;;  %v323_v3 = vld [vmem:[%s1141_s23 + $0xf8] sm:$0xff] }
  0x34   : > { %v446_v6 = vld [vmem:[%s1141_s23 + $0x4d0] sm:$0xff]  ;;  %691 = vmatpush.msrb.mxu2 %v512_v4  ;;  %710 = vmatpush.msrb.mxu3 %v546_v5  ;;  %v444_v10 = vld [vmem:[%s1141_s23 + $0x4c0] sm:$0xff]  ;;  %v387_v4 = vld [vmem:[%s1141_s23 + $0x2f8] sm:$0xff] }
  0x35   : > { %v510_v8 = vld [vmem:[%s1141_s23 + $0x6d0] sm:$0xff]  ;;  %652 = vmatpush.msrb.mxu0 %v446_v6  ;;  %671 = vmatpush.msrb.mxu1 %v480_v7  ;;  %v508_v12 = vld [vmem:[%s1141_s23 + $0x6c0] sm:$0xff] }
  0x36   : > { %v478_v11 = vld [vmem:[%s1141_s23 + $0x5d0] sm:$0xff]  ;;  %692 = vmatpush.msrb.mxu2 %v510_v8  ;;  %711 = vmatpush.msrb.mxu3 %v544_v9  ;;  %v476_v15 = vld [vmem:[%s1141_s23 + $0x5c0] sm:$0xff]  ;;  %v321_v8 = vld [vmem:[%s1141_s23 + $0xe8] sm:$0xff] }
  0x37   : > { %v542_v13 = vld [vmem:[%s1141_s23 + $0x7d0] sm:$0xff]  ;;  %653 = vmatpush.msrb.mxu0 %v444_v10  ;;  %672 = vmatpush.msrb.mxu1 %v478_v11  ;;  %v540_v17 = vld [vmem:[%s1141_s23 + $0x7c0] sm:$0xff]  ;;  %v355_v9 = vld [vmem:[%s1141_s23 + $0x1f8] sm:$0xff] }
  0x38   : > { %v442_v14 = vld [vmem:[%s1141_s23 + $0x4b0] sm:$0xff]  ;;  %693 = vmatpush.msrb.mxu2 %v508_v12  ;;  %712 = vmatpush.msrb.mxu3 %v542_v13  ;;  %v440_v18 = vld [vmem:[%s1141_s23 + $0x4a0] sm:$0xff]  ;;  %v385_v10 = vld [vmem:[%s1141_s23 + $0x2e8] sm:$0xff] }
  0x39   : > { %v506_v16 = vld [vmem:[%s1141_s23 + $0x6b0] sm:$0xff]  ;;  %654 = vmatpush.msrb.mxu0 %v442_v14  ;;  %673 = vmatpush.msrb.mxu1 %v476_v15  ;;  %v504_v20 = vld [vmem:[%s1141_s23 + $0x6a0] sm:$0xff]  ;;  %v419_v11 = vld [vmem:[%s1141_s23 + $0x3f8] sm:$0xff] }
  0x3a   : > { %v474_v19 = vld [vmem:[%s1141_s23 + $0x5b0] sm:$0xff]  ;;  %v290_v22 = vld [vmem:[%s1464_s0] sm:$0xff]  ;;  %694 = vmatpush.msrb.mxu2 %v506_v16  ;;  %713 = vmatpush.msrb.mxu3 %v540_v17  ;;  %v319_v12 = vld [vmem:[%s1141_s23 + $0xd8] sm:$0xff] }
  0x3b   : > { %v538_v21 = vld [vmem:[%s1141_s23 + $0x7b0] sm:$0xff]  ;;  %v472_v24 = vld [vmem:[%s1141_s23 + $0x5a0] sm:$0xff]  ;;  %551 = vst [vmem:[#allocation1] ss:$4 sm:$0xff] %v290_v22  ;;  %655 = vmatpush.msrb.mxu0 %v440_v18  ;;  %674 = vmatpush.msrb.mxu1 %v474_v19  ;;  %v353_v13 = vld [vmem:[%s1141_s23 + $0x1e8] sm:$0xff] }
  0x3c   : > { %v438_v23 = vld [vmem:[%s1141_s23 + $0x490] sm:$0xff]  ;;  %v536_v26 = vld [vmem:[%s1141_s23 + $0x7a0] sm:$0xff]  ;;  %695 = vmatpush.msrb.mxu2 %v504_v20  ;;  %714 = vmatpush.msrb.mxu3 %v538_v21  ;;  %v383_v14 = vld [vmem:[%s1141_s23 + $0x2d8] sm:$0xff] }
  0x3d   : > { %v502_v25 = vld [vmem:[%s1141_s23 + $0x690] sm:$0xff]  ;;  %v436_v27 = vld [vmem:[%s1141_s23 + $0x480] sm:$0xff]  ;;  %656 = vmatpush.msrb.mxu0 %v438_v23  ;;  %675 = vmatpush.msrb.mxu1 %v472_v24  ;;  %v417_v15 = vld [vmem:[%s1141_s23 + $0x3e8] sm:$0xff] }
  0x3e   : > { %v470_v28 = vld [vmem:[%s1141_s23 + $0x590] sm:$0xff]  ;;  %v500_v29 = vld [vmem:[%s1141_s23 + $0x680] sm:$0xff]  ;;  %696 = vmatpush.msrb.mxu2 %v502_v25  ;;  %715 = vmatpush.msrb.mxu3 %v536_v26  ;;  %v317_v17 = vld [vmem:[%s1141_s23 + $0xc8] sm:$0xff] }
  0x3f   : > { %v534_v30 = vld [vmem:[%s1141_s23 + $0x790] sm:$0xff]  ;;  %v468_v32 = vld [vmem:[%s1141_s23 + $0x580] sm:$0xff]  ;;  %657 = vmatpush.msrb.mxu0 %v436_v27  ;;  %676 = vmatpush.msrb.mxu1 %v470_v28  ;;  %v351_v18 = vld [vmem:[%s1141_s23 + $0x1d8] sm:$0xff] }
  0x40   : > { %v434_v31 = vld [vmem:[%s1141_s23 + $0x470] sm:$0xff]  ;;  %v532_v34 = vld [vmem:[%s1141_s23 + $0x780] sm:$0xff]  ;;  %697 = vmatpush.msrb.mxu2 %v500_v29  ;;  %716 = vmatpush.msrb.mxu3 %v534_v30  ;;  %v381_v19 = vld [vmem:[%s1141_s23 + $0x2c8] sm:$0xff] }
  0x41   : > { %v498_v33 = vld [vmem:[%s1141_s23 + $0x670] sm:$0xff]  ;;  %v432_v36 = vld [vmem:[%s1141_s23 + $0x460] sm:$0xff]  ;;  %658 = vmatpush.msrb.mxu0 %v434_v31  ;;  %677 = vmatpush.msrb.mxu1 %v468_v32  ;;  %v415_v20 = vld [vmem:[%s1141_s23 + $0x3d8] sm:$0xff] }
  0x42   : > { %v466_v37 = vld [vmem:[%s1141_s23 + $0x570] sm:$0xff]  ;;  %v496_v38 = vld [vmem:[%s1141_s23 + $0x660] sm:$0xff]  ;;  %698 = vmatpush.msrb.mxu2 %v498_v33  ;;  %717 = vmatpush.msrb.mxu3 %v532_v34  ;;  %v1280_v2 = vld.sshfl [vmem:[#allocation1 + $0x18] sm:$0xff pattern:$0x73625140] }
  0x43   : > { %v530_v39 = vld [vmem:[%s1141_s23 + $0x770] sm:$0xff]  ;;  %v464_v41 = vld [vmem:[%s1141_s23 + $0x560] sm:$0xff]  ;;  %659 = vmatpush.msrb.mxu0 %v432_v36  ;;  %678 = vmatpush.msrb.mxu1 %v466_v37  ;;  %v1287_v7 = vld.sshfl [vmem:[#allocation1 + $0x8] sm:$0xff pattern:$0x73625140] }
  0x44   : > { %v430_v40 = vld [vmem:[%s1141_s23 + $0x450] sm:$0xff]  ;;  %v528_v43 = vld [vmem:[%s1141_s23 + $0x760] sm:$0xff]  ;;  %699 = vmatpush.msrb.mxu2 %v496_v38  ;;  %718 = vmatpush.msrb.mxu3 %v530_v39  ;;  %v1308_v22 = vld.sshfl [vmem:[#allocation1 + $0x38] sm:$0xff pattern:$0x73625140] }
  0x45   : > { %v494_v42 = vld [vmem:[%s1141_s23 + $0x650] sm:$0xff]  ;;  %v428_v44 = vld [vmem:[%s1141_s23 + $0x440] sm:$0xff]  ;;  %660 = vmatpush.msrb.mxu0 %v430_v40  ;;  %679 = vmatpush.msrb.mxu1 %v464_v41  ;;  %v315_v23 = vld [vmem:[%s1141_s23 + $0xb8] sm:$0xff] }
  0x46   : > { %v462_v45 = vld [vmem:[%s1141_s23 + $0x550] sm:$0xff]  ;;  %v492_v46 = vld [vmem:[%s1141_s23 + $0x640] sm:$0xff]  ;;  %700 = vmatpush.msrb.mxu2 %v494_v42  ;;  %719 = vmatpush.msrb.mxu3 %v528_v43  ;;  %v349_v24 = vld [vmem:[%s1141_s23 + $0x1c8] sm:$0xff] }
  0x47   : > { %v526_v47 = vld [vmem:[%s1141_s23 + $0x750] sm:$0xff]  ;;  %v460_v49 = vld [vmem:[%s1141_s23 + $0x540] sm:$0xff]  ;;  %661 = vmatpush.msrb.mxu0 %v428_v44  ;;  %680 = vmatpush.msrb.mxu1 %v462_v45  ;;  %v379_v25 = vld [vmem:[%s1141_s23 + $0x2b8] sm:$0xff] }
  0x48   : > { %v426_v48 = vld [vmem:[%s1141_s23 + $0x430] sm:$0xff]  ;;  %v524_v51 = vld [vmem:[%s1141_s23 + $0x740] sm:$0xff]  ;;  %701 = vmatpush.msrb.mxu2 %v492_v46  ;;  %720 = vmatpush.msrb.mxu3 %v526_v47  ;;  %v413_v26 = vld [vmem:[%s1141_s23 + $0x3c8] sm:$0xff] }
  0x49   : > { %v490_v50 = vld [vmem:[%s1141_s23 + $0x630] sm:$0xff]  ;;  %v424_v52 = vld [vmem:[%s1141_s23 + $0x420] sm:$0xff]  ;;  %662 = vmatpush.msrb.mxu0 %v426_v48  ;;  %681 = vmatpush.msrb.mxu1 %v460_v49  ;;  %v1315_v27 = vld.sshfl [vmem:[#allocation1 + $0x28] sm:$0xff pattern:$0x73625140] }
  0x4a   : > { %v458_v53 = vld [vmem:[%s1141_s23 + $0x530] sm:$0xff]  ;;  %v488_v54 = vld [vmem:[%s1141_s23 + $0x620] sm:$0xff]  ;;  %702 = vmatpush.msrb.mxu2 %v490_v50  ;;  %721 = vmatpush.msrb.mxu3 %v524_v51  ;;  %v313_v28 = vld [vmem:[%s1141_s23 + $0xa8] sm:$0xff] }
  0x4b   : > { %v522_v55 = vld [vmem:[%s1141_s23 + $0x730] sm:$0xff]  ;;  %v456_v57 = vld [vmem:[%s1141_s23 + $0x520] sm:$0xff]  ;;  %663 = vmatpush.msrb.mxu0 %v424_v52  ;;  %682 = vmatpush.msrb.mxu1 %v458_v53  ;;  %v347_v29 = vld [vmem:[%s1141_s23 + $0x1b8] sm:$0xff] }
  0x4c   : > { %v422_v56 = vld [vmem:[%s1141_s23 + $0x410] sm:$0xff]  ;;  %v520_v59 = vld [vmem:[%s1141_s23 + $0x720] sm:$0xff]  ;;  %703 = vmatpush.msrb.mxu2 %v488_v54  ;;  %722 = vmatpush.msrb.mxu3 %v522_v55  ;;  %v377_v30 = vld [vmem:[%s1141_s23 + $0x2a8] sm:$0xff] }
  0x4d   : > { %v486_v58 = vld [vmem:[%s1141_s23 + $0x610] sm:$0xff]  ;;  %v420_v61 = vld [vmem:[%s1141_s23 + $0x400] sm:$0xff]  ;;  %664 = vmatpush.msrb.mxu0 %v422_v56  ;;  %683 = vmatpush.msrb.mxu1 %v456_v57  ;;  %v411_v31 = vld [vmem:[%s1141_s23 + $0x3b8] sm:$0xff] }
  0x4e   : > { %v1271_v60 = vld.sshfl [vmem:[#allocation1 + $0x10] sm:$0xff pattern:$0x73625140]  ;;  %v484_v63 = vld [vmem:[%s1141_s23 + $0x600] sm:$0xff]  ;;  %704 = vmatpush.msrb.mxu2 %v486_v58  ;;  %723 = vmatpush.msrb.mxu3 %v520_v59  ;;  %v311_v32 = vld [vmem:[%s1141_s23 + $0x98] sm:$0xff] }
  0x4f   : > { %v454_v62 = vld [vmem:[%s1141_s23 + $0x510] sm:$0xff]  ;;  %v1277_v1 = vld.sshfl [vmem:[#allocation1] sm:$0xff pattern:$0x73625140]  ;;  %626 = vmatmul.f32.vlgmr.msra.gmra.mxu2 %v1271_v60  ;;  %665 = vmatpush.msrb.mxu0 %v420_v61  ;;  %v345_v33 = vld [vmem:[%s1141_s23 + $0x1a8] sm:$0xff] }
  0x50   : > { %v518_v0 = vld [vmem:[%s1141_s23 + $0x710] sm:$0xff]  ;;  %684 = vmatpush.msrb.mxu1 %v454_v62  ;;  %705 = vmatpush.msrb.mxu2 %v484_v63  ;;  %v452_v5 = vld [vmem:[%s1141_s23 + $0x500] sm:$0xff]  ;;  %v375_v34 = vld [vmem:[%s1141_s23 + $0x298] sm:$0xff] }
  0x51   : > { %724 = vmatpush.msrb.mxu3 %v518_v0  ;;  %586 = vmatmul.f32.vlgmr.msra.gmra.mxu0 %v1277_v1  ;;  %v516_v6 = vld [vmem:[%s1141_s23 + $0x700] sm:$0xff]  ;;  %v1299_v16 = vld.sshfl [vmem:[#allocation1 + $0x30] sm:$0xff pattern:$0x73625140]  ;;  %v309_v36 = vld [vmem:[%s1141_s23 + $0x88] sm:$0xff] }
  0x52   : > { %646 = vmatmul.f32.vlgmr.msra.gmra.mxu3 %v1280_v2  ;;  %730 = vmatpush.msra.mxu0 %v323_v3  ;;  %v1305_v21 = vld.sshfl [vmem:[#allocation1 + $0x20] sm:$0xff pattern:$0x73625140]  ;;  %v343_v37 = vld [vmem:[%s1141_s23 + $0x198] sm:$0xff]  ;;  %v373_v38 = vld [vmem:[%s1141_s23 + $0x288] sm:$0xff] }
  0x53   : > { %770 = vmatpush.msra.mxu2 %v387_v4  ;;  %685 = vmatpush.msrb.mxu1 %v452_v5  ;;  %v407_v39 = vld [vmem:[%s1141_s23 + $0x398] sm:$0xff]  ;;  %v341_v41 = vld [vmem:[%s1141_s23 + $0x188] sm:$0xff] }
  0x54   : > { %725 = vmatpush.msrb.mxu3 %v516_v6  ;;  %606 = vmatmul.f32.vlgmr.msra.gmra.mxu1 %v1287_v7  ;;  %v307_v40 = vld [vmem:[%s1141_s23 + $0x78] sm:$0xff]  ;;  %v405_v43 = vld [vmem:[%s1141_s23 + $0x388] sm:$0xff] }
  0x55   : > { %731 = vmatpush.msra.mxu0 %v321_v8  ;;  %750 = vmatpush.msra.mxu1 %v355_v9  ;;  %v371_v42 = vld [vmem:[%s1141_s23 + $0x278] sm:$0xff]  ;;  %v305_v44 = vld [vmem:[%s1141_s23 + $0x68] sm:$0xff] }
  0x56   : > { %771 = vmatpush.msra.mxu2 %v385_v10  ;;  %790 = vmatpush.msra.mxu3 %v419_v11  ;;  %v339_v45 = vld [vmem:[%s1141_s23 + $0x178] sm:$0xff]  ;;  %v369_v46 = vld [vmem:[%s1141_s23 + $0x268] sm:$0xff] }
  0x57   : > { %732 = vmatpush.msra.mxu0 %v319_v12  ;;  %751 = vmatpush.msra.mxu1 %v353_v13  ;;  %v403_v47 = vld [vmem:[%s1141_s23 + $0x378] sm:$0xff]  ;;  %v337_v49 = vld [vmem:[%s1141_s23 + $0x168] sm:$0xff] }
  0x58   : > { %772 = vmatpush.msra.mxu2 %v383_v14  ;;  %791 = vmatpush.msra.mxu3 %v417_v15  ;;  %v303_v48 = vld [vmem:[%s1141_s23 + $0x58] sm:$0xff]  ;;  %v401_v51 = vld [vmem:[%s1141_s23 + $0x368] sm:$0xff] }
  0x59   : > { %706 = vmatmul.f32.vlgmr.msrb.gmra.mxu2 %v1299_v16  ;;  %733 = vmatpush.msra.mxu0 %v317_v17  ;;  %v367_v50 = vld [vmem:[%s1141_s23 + $0x258] sm:$0xff]  ;;  %v301_v52 = vld [vmem:[%s1141_s23 + $0x48] sm:$0xff] }
  0x5a   : > { %752 = vmatpush.msra.mxu1 %v351_v18  ;;  %773 = vmatpush.msra.mxu2 %v381_v19  ;;  %v335_v53 = vld [vmem:[%s1141_s23 + $0x158] sm:$0xff]  ;;  %v365_v54 = vld [vmem:[%s1141_s23 + $0x248] sm:$0xff] }
  0x5b   : > { %792 = vmatpush.msra.mxu3 %v415_v20  ;;  %666 = vmatmul.f32.vlgmr.msrb.gmra.mxu0 %v1305_v21  ;;  %v399_v55 = vld [vmem:[%s1141_s23 + $0x358] sm:$0xff]  ;;  %v333_v57 = vld [vmem:[%s1141_s23 + $0x148] sm:$0xff] }
  0x5c   : > { %726 = vmatmul.f32.vlgmr.msrb.gmra.mxu3 %v1308_v22  ;;  %734 = vmatpush.msra.mxu0 %v315_v23  ;;  %v299_v56 = vld [vmem:[%s1141_s23 + $0x38] sm:$0xff]  ;;  %v397_v59 = vld [vmem:[%s1141_s23 + $0x348] sm:$0xff] }
  0x5d   : > { %753 = vmatpush.msra.mxu1 %v349_v24  ;;  %774 = vmatpush.msra.mxu2 %v379_v25  ;;  %v363_v58 = vld [vmem:[%s1141_s23 + $0x238] sm:$0xff]  ;;  %v297_v61 = vld [vmem:[%s1141_s23 + $0x28] sm:$0xff] }
  0x5e   : > { %793 = vmatpush.msra.mxu3 %v413_v26  ;;  %686 = vmatmul.f32.vlgmr.msrb.gmra.mxu1 %v1315_v27  ;;  %v331_v62 = vld [vmem:[%s1141_s23 + $0x138] sm:$0xff]  ;;  %v361_v63 = vld [vmem:[%s1141_s23 + $0x228] sm:$0xff] }
  0x5f   : > { %735 = vmatpush.msra.mxu0 %v313_v28  ;;  %754 = vmatpush.msra.mxu1 %v347_v29  ;;  %v395_v0 = vld [vmem:[%s1141_s23 + $0x338] sm:$0xff]  ;;  %v329_v4 = vld [vmem:[%s1141_s23 + $0x128] sm:$0xff] }
  0x60   : > { %775 = vmatpush.msra.mxu2 %v377_v30  ;;  %794 = vmatpush.msra.mxu3 %v411_v31  ;;  %v295_v3 = vld [vmem:[%s1141_s23 + $0x18] sm:$0xff]  ;;  %v393_v6 = vld [vmem:[%s1141_s23 + $0x328] sm:$0xff] }
  0x61   : > { %736 = vmatpush.msra.mxu0 %v311_v32  ;;  %755 = vmatpush.msra.mxu1 %v345_v33  ;;  %v359_v5 = vld [vmem:[%s1141_s23 + $0x218] sm:$0xff]  ;;  %v293_v8 = vld [vmem:[%s1141_s23 + $0x8] sm:$0xff] }
  0x62   : > { %776 = vmatpush.msra.mxu2 %v375_v34  ;;  %795 = vmatpush.msra.mxu3 %v409_v35  ;;  %v327_v9 = vld [vmem:[%s1141_s23 + $0x118] sm:$0xff]  ;;  %v357_v10 = vld [vmem:[%s1141_s23 + $0x208] sm:$0xff] }
  0x63   : > { %737 = vmatpush.msra.mxu0 %v309_v36  ;;  %756 = vmatpush.msra.mxu1 %v343_v37  ;;  %v391_v11 = vld [vmem:[%s1141_s23 + $0x318] sm:$0xff]  ;;  %v325_v14 = vld [vmem:[%s1141_s23 + $0x108] sm:$0xff] }
  0x64   : > { %777 = vmatpush.msra.mxu2 %v373_v38  ;;  %796 = vmatpush.msra.mxu3 %v407_v39  ;;  %v451_v12 = vld [vmem:[%s1141_s23 + $0x4f8] sm:$0xff]  ;;  %v389_v15 = vld [vmem:[%s1141_s23 + $0x308] sm:$0xff] }
  0x65   : > { %738 = vmatpush.msra.mxu0 %v307_v40  ;;  %757 = vmatpush.msra.mxu1 %v341_v41  ;;  %v515_v13 = vld [vmem:[%s1141_s23 + $0x6f8] sm:$0xff]  ;;  %v449_v17 = vld [vmem:[%s1141_s23 + $0x4e8] sm:$0xff] }
  0x66   : > { %778 = vmatpush.msra.mxu2 %v371_v42  ;;  %797 = vmatpush.msra.mxu3 %v405_v43  ;;  %v483_v18 = vld [vmem:[%s1141_s23 + $0x5f8] sm:$0xff]  ;;  %v513_v19 = vld [vmem:[%s1141_s23 + $0x6e8] sm:$0xff] }
  0x67   : > { %739 = vmatpush.msra.mxu0 %v305_v44  ;;  %758 = vmatpush.msra.mxu1 %v339_v45  ;;  %v547_v20 = vld [vmem:[%s1141_s23 + $0x7f8] sm:$0xff]  ;;  %v481_v24 = vld [vmem:[%s1141_s23 + $0x5e8] sm:$0xff] }
  0x68   : > { %779 = vmatpush.msra.mxu2 %v369_v46  ;;  %798 = vmatpush.msra.mxu3 %v403_v47  ;;  %v447_v23 = vld [vmem:[%s1141_s23 + $0x4d8] sm:$0xff]  ;;  %v545_v26 = vld [vmem:[%s1141_s23 + $0x7e8] sm:$0xff] }
  0x69   : > { %740 = vmatpush.msra.mxu0 %v303_v48  ;;  %759 = vmatpush.msra.mxu1 %v337_v49  ;;  %v511_v25 = vld [vmem:[%s1141_s23 + $0x6d8] sm:$0xff]  ;;  %v445_v28 = vld [vmem:[%s1141_s23 + $0x4c8] sm:$0xff] }
  0x6a   : > { %780 = vmatpush.msra.mxu2 %v367_v50  ;;  %799 = vmatpush.msra.mxu3 %v401_v51  ;;  %v479_v29 = vld [vmem:[%s1141_s23 + $0x5d8] sm:$0xff]  ;;  %v509_v30 = vld [vmem:[%s1141_s23 + $0x6c8] sm:$0xff] }
  0x6b   : > { %741 = vmatpush.msra.mxu0 %v301_v52  ;;  %760 = vmatpush.msra.mxu1 %v335_v53  ;;  %v543_v31 = vld [vmem:[%s1141_s23 + $0x7d8] sm:$0xff]  ;;  %v477_v33 = vld [vmem:[%s1141_s23 + $0x5c8] sm:$0xff] }
  0x6c   : > { %781 = vmatpush.msra.mxu2 %v365_v54  ;;  %800 = vmatpush.msra.mxu3 %v399_v55  ;;  %v443_v32 = vld [vmem:[%s1141_s23 + $0x4b8] sm:$0xff]  ;;  %v541_v35 = vld [vmem:[%s1141_s23 + $0x7c8] sm:$0xff] }
  0x6d   : > { %742 = vmatpush.msra.mxu0 %v299_v56  ;;  %761 = vmatpush.msra.mxu1 %v333_v57  ;;  %v507_v34 = vld [vmem:[%s1141_s23 + $0x6b8] sm:$0xff]  ;;  %v441_v36 = vld [vmem:[%s1141_s23 + $0x4a8] sm:$0xff] }
  0x6e   : > { %782 = vmatpush.msra.mxu2 %v363_v58  ;;  %801 = vmatpush.msra.mxu3 %v397_v59  ;;  %v475_v37 = vld [vmem:[%s1141_s23 + $0x5b8] sm:$0xff]  ;;  %v505_v38 = vld [vmem:[%s1141_s23 + $0x6a8] sm:$0xff] }
  0x6f   : > { %743 = vmatpush.msra.mxu0 %v297_v61  ;;  %762 = vmatpush.msra.mxu1 %v331_v62  ;;  %v539_v39 = vld [vmem:[%s1141_s23 + $0x7b8] sm:$0xff]  ;;  %v473_v41 = vld [vmem:[%s1141_s23 + $0x5a8] sm:$0xff] }
  0x70   : > { %783 = vmatpush.msra.mxu2 %v361_v63  ;;  %802 = vmatpush.msra.mxu3 %v395_v0  ;;  %v439_v40 = vld [vmem:[%s1141_s23 + $0x498] sm:$0xff]  ;;  %v537_v43 = vld [vmem:[%s1141_s23 + $0x7a8] sm:$0xff] }
  0x71   : > { %744 = vmatpush.msra.mxu0 %v295_v3  ;;  %763 = vmatpush.msra.mxu1 %v329_v4  ;;  %v503_v42 = vld [vmem:[%s1141_s23 + $0x698] sm:$0xff]  ;;  %v437_v44 = vld [vmem:[%s1141_s23 + $0x488] sm:$0xff] }
  0x72   : > { %784 = vmatpush.msra.mxu2 %v359_v5  ;;  %803 = vmatpush.msra.mxu3 %v393_v6  ;;  %v471_v45 = vld [vmem:[%s1141_s23 + $0x598] sm:$0xff]  ;;  %v501_v46 = vld [vmem:[%s1141_s23 + $0x688] sm:$0xff] }
  0x73   : > { %745 = vmatpush.msra.mxu0 %v293_v8  ;;  %764 = vmatpush.msra.mxu1 %v327_v9  ;;  %v535_v47 = vld [vmem:[%s1141_s23 + $0x798] sm:$0xff]  ;;  %v469_v49 = vld [vmem:[%s1141_s23 + $0x588] sm:$0xff] }
  0x74   : > { %785 = vmatpush.msra.mxu2 %v357_v10  ;;  %804 = vmatpush.msra.mxu3 %v391_v11  ;;  %v435_v48 = vld [vmem:[%s1141_s23 + $0x478] sm:$0xff]  ;;  %v533_v51 = vld [vmem:[%s1141_s23 + $0x788] sm:$0xff] }
  0x75   : > { %810 = vmatpush.msrb.mxu0 %v451_v12  ;;  %765 = vmatpush.msra.mxu1 %v325_v14  ;;  %v499_v50 = vld [vmem:[%s1141_s23 + $0x678] sm:$0xff]  ;;  %v433_v52 = vld [vmem:[%s1141_s23 + $0x468] sm:$0xff] }
  0x76   : > { %850 = vmatpush.msrb.mxu2 %v515_v13  ;;  %805 = vmatpush.msra.mxu3 %v389_v15  ;;  %v467_v53 = vld [vmem:[%s1141_s23 + $0x578] sm:$0xff]  ;;  %v497_v54 = vld [vmem:[%s1141_s23 + $0x668] sm:$0xff] }
  0x77   : > { %811 = vmatpush.msrb.mxu0 %v449_v17  ;;  %830 = vmatpush.msrb.mxu1 %v483_v18  ;;  %v531_v55 = vld [vmem:[%s1141_s23 + $0x778] sm:$0xff]  ;;  %v465_v57 = vld [vmem:[%s1141_s23 + $0x568] sm:$0xff] }
  0x78   : > { %851 = vmatpush.msrb.mxu2 %v513_v19  ;;  %870 = vmatpush.msrb.mxu3 %v547_v20  ;;  %v431_v56 = vld [vmem:[%s1141_s23 + $0x458] sm:$0xff]  ;;  %v529_v59 = vld [vmem:[%s1141_s23 + $0x768] sm:$0xff]  ;;  %v1090_v20 = vmov 0.0  }
  0x79   : > { %812 = vmatpush.msrb.mxu0 %v447_v23  ;;  %831 = vmatpush.msrb.mxu1 %v481_v24  ;;  %v495_v58 = vld [vmem:[%s1141_s23 + $0x658] sm:$0xff]  ;;  %v429_v61 = vld [vmem:[%s1141_s23 + $0x448] sm:$0xff]  ;;  %289 = vst [vmem:[#allocation2] sm:$0xf] %v1090_v20 }
  0x7a   : > { %852 = vmatpush.msrb.mxu2 %v511_v25  ;;  %871 = vmatpush.msrb.mxu3 %v545_v26  ;;  %v463_v62 = vld [vmem:[%s1141_s23 + $0x558] sm:$0xff]  ;;  %v493_v63 = vld [vmem:[%s1141_s23 + $0x648] sm:$0xff] }
  0x7b   : > { %813 = vmatpush.msrb.mxu0 %v445_v28  ;;  %832 = vmatpush.msrb.mxu1 %v479_v29  ;;  %v527_v0 = vld [vmem:[%s1141_s23 + $0x758] sm:$0xff]  ;;  %v461_v4 = vld [vmem:[%s1141_s23 + $0x548] sm:$0xff] }
  0x7c   : > { %853 = vmatpush.msrb.mxu2 %v509_v30  ;;  %872 = vmatpush.msrb.mxu3 %v543_v31  ;;  %v427_v3 = vld [vmem:[%s1141_s23 + $0x438] sm:$0xff]  ;;  %v525_v6 = vld [vmem:[%s1141_s23 + $0x748] sm:$0xff] }
  0x7d   : > { %814 = vmatpush.msrb.mxu0 %v443_v32  ;;  %833 = vmatpush.msrb.mxu1 %v477_v33  ;;  %v491_v5 = vld [vmem:[%s1141_s23 + $0x638] sm:$0xff]  ;;  %v489_v9 = vld [vmem:[%s1141_s23 + $0x628] sm:$0xff] }
  0x7e   : > { %854 = vmatpush.msrb.mxu2 %v507_v34  ;;  %873 = vmatpush.msrb.mxu3 %v541_v35  ;;  %v459_v8 = vld [vmem:[%s1141_s23 + $0x538] sm:$0xff]  ;;  %v457_v11 = vld [vmem:[%s1141_s23 + $0x528] sm:$0xff] }
  0x7f   : > { %815 = vmatpush.msrb.mxu0 %v441_v36  ;;  %834 = vmatpush.msrb.mxu1 %v475_v37  ;;  %v523_v10 = vld [vmem:[%s1141_s23 + $0x738] sm:$0xff]  ;;  %v521_v12 = vld [vmem:[%s1141_s23 + $0x728] sm:$0xff] }
  0x80   : > { %855 = vmatpush.msrb.mxu2 %v505_v38  ;;  %874 = vmatpush.msrb.mxu3 %v539_v39  ;;  %v421_v13 = vld [vmem:[%s1141_s23 + $0x408] sm:$0xff]  ;;  %v455_v14 = vld [vmem:[%s1141_s23 + $0x518] sm:$0xff] }
  0x81   : > { %816 = vmatpush.msrb.mxu0 %v439_v40  ;;  %835 = vmatpush.msrb.mxu1 %v473_v41  ;;  %v485_v15 = vld [vmem:[%s1141_s23 + $0x608] sm:$0xff]  ;;  %v519_v17 = vld [vmem:[%s1141_s23 + $0x718] sm:$0xff] }
  0x82   : > { %856 = vmatpush.msrb.mxu2 %v503_v42  ;;  %875 = vmatpush.msrb.mxu3 %v537_v43  ;;  %v517_v18 = vld [vmem:[%s1141_s23 + $0x708] sm:$0xff] }
  0x83   : > { %817 = vmatpush.msrb.mxu0 %v437_v44  ;;  %836 = vmatpush.msrb.mxu1 %v471_v45 }
  0x84   : > { %857 = vmatpush.msrb.mxu2 %v501_v46  ;;  %876 = vmatpush.msrb.mxu3 %v535_v47 }
  0x85   : > { %818 = vmatpush.msrb.mxu0 %v435_v48  ;;  %837 = vmatpush.msrb.mxu1 %v469_v49  ;;  %v902_v48 = vld [vmem:[%s277_s5] sm:$0x3] }
  0x86   : > { %858 = vmatpush.msrb.mxu2 %v499_v50  ;;  %877 = vmatpush.msrb.mxu3 %v533_v51  ;;  %v548_v50 = vld [vmem:[#allocation2] sm:$0xf] }
  0x87   : > { %819 = vmatpush.msrb.mxu0 %v433_v52  ;;  %838 = vmatpush.msrb.mxu1 %v467_v53  ;;  %v910_v52 = vld [vmem:[%s272_s8] sm:$0x3] }
  0x88   : > { %859 = vmatpush.msrb.mxu2 %v497_v54  ;;  %878 = vmatpush.msrb.mxu3 %v531_v55  ;;  %v905_v54 = vperm.slane %v902_v48, 1 }
  0x89   : > { %820 = vmatpush.msrb.mxu0 %v431_v56  ;;  %839 = vmatpush.msrb.mxu1 %v465_v57  ;;  %v913_v56 = vperm.slane %v910_v52, 1  ;;  %v904_v57 = vperm.slane %v902_v48, 0 }
  0x8a   : > { %860 = vmatpush.msrb.mxu2 %v495_v58  ;;  %879 = vmatpush.msrb.mxu3 %v529_v59  ;;  %v906_v58 = vrot.slane %v905_v54, 6  ;;  %v912_v59 = vperm.slane %v910_v52, 0 }
  0x8b   : > { %786 = vmatmul.f32.vlgmr.msra.gmra.mxu2 %v1271_v60  ;;  %821 = vmatpush.msrb.mxu0 %v429_v61  ;;  %v425_v60 = vld [vmem:[%s1141_s23 + $0x428] sm:$0xff]  ;;  %v914_v61 = vrot.slane %v913_v56, 6 }
  0x8c   : > { %840 = vmatpush.msrb.mxu1 %v463_v62  ;;  %861 = vmatpush.msrb.mxu2 %v493_v63  ;;  %v907_v62 = vsel %vm893_vm0, %v904_v57, %v906_v58 }
  0x8d   : > { %880 = vmatpush.msrb.mxu3 %v527_v0  ;;  %746 = vmatmul.f32.vlgmr.msra.gmra.mxu0 %v1277_v1  ;;  %v423_v1 = vld [vmem:[%s1141_s23 + $0x418] sm:$0xff]  ;;  %v915_v0 = vsel %vm893_vm0, %v912_v59, %v914_v61 }
  0x8e   : > { %806 = vmatmul.f32.vlgmr.msra.gmra.mxu3 %v1280_v2  ;;  %822 = vmatpush.msrb.mxu0 %v427_v3  ;;  %v487_v2 = vld [vmem:[%s1141_s23 + $0x618] sm:$0xff] }
  0x8f   : > { %841 = vmatpush.msrb.mxu1 %v461_v4  ;;  %862 = vmatpush.msrb.mxu2 %v491_v5 }
  0x90   : > { %881 = vmatpush.msrb.mxu3 %v525_v6  ;;  %766 = vmatmul.f32.vlgmr.msra.gmra.mxu1 %v1287_v7  ;;  %v453_v7 = vld [vmem:[%s1141_s23 + $0x508] sm:$0xff] }
  0x91   : > { %823 = vmatpush.msrb.mxu0 %v425_v60  ;;  %842 = vmatpush.msrb.mxu1 %v459_v8 }
  0x92   : > { %863 = vmatpush.msrb.mxu2 %v489_v9  ;;  %882 = vmatpush.msrb.mxu3 %v523_v10 }
  0x93   : > { %824 = vmatpush.msrb.mxu0 %v423_v1  ;;  %843 = vmatpush.msrb.mxu1 %v457_v11 }
  0x94   : > { %864 = vmatpush.msrb.mxu2 %v487_v2  ;;  %883 = vmatpush.msrb.mxu3 %v521_v12 }
  0x95   : > { %825 = vmatpush.msrb.mxu0 %v421_v13  ;;  %844 = vmatpush.msrb.mxu1 %v455_v14 }
  0x96   : > { %865 = vmatpush.msrb.mxu2 %v485_v15  ;;  %884 = vmatpush.msrb.mxu3 %v519_v17 }
  0x97   : > { %826 = vmatmul.f32.vlgmr.msrb.gmra.mxu0 %v1305_v21  ;;  %866 = vmatmul.f32.vlgmr.msrb.gmra.mxu2 %v1299_v16 }
  0x98   : > { %845 = vmatpush.msrb.mxu1 %v453_v7  ;;  %885 = vmatpush.msrb.mxu3 %v517_v18 }
  0x99   : > { %846 = vmatmul.f32.vlgmr.msrb.gmra.mxu1 %v1315_v27  ;;  %886 = vmatmul.f32.vlgmr.msrb.gmra.mxu3 %v1308_v22 }
  0xce   : > { %v587_v19 = vpop.f32.mrf.mxu0 }
  0xd1   : > { %v607_v23 = vpop.f32.mrf.mxu1 }
  0xd2   : > { %v627_v24 = vpop.f32.mrf.mxu2  ;;  %v608_v30 = vadd.f32 %v607_v23, %v587_v19 }
  0xd4   : > { %v628_v16 = vadd.f32 %v627_v24, %v608_v30 }
  0xd5   : > { %v647_v25 = vpop.f32.mrf.mxu3 }
  0xd6   : > { %v648_v27 = vadd.f32 %v647_v25, %v628_v16 }
  0xd8   : > { %v667_v26 = vpop.f32.mrf.mxu0 }
  0xd9   : > { %v668_v37 = vadd.f32 %v667_v26, %v648_v27 }
  0xdb   : > { %v687_v28 = vpop.f32.mrf.mxu1 }
  0xdc   : > { %v707_v29 = vpop.f32.mrf.mxu2  ;;  %v688_v41 = vadd.f32 %v687_v28, %v668_v37 }
  0xde   : > { %v708_v44 = vadd.f32 %v707_v29, %v688_v41 }
  0xdf   : > { %v727_v21 = vpop.f32.mrf.mxu3 }
  0xe0   : > { %v728_v49 = vadd.f32 %v727_v21, %v708_v44 }
 0x10a   : > { %v747_v31 = vpop.f32.mrf.mxu0 }
 0x10d   : > { %v767_v32 = vpop.f32.mrf.mxu1 }
 0x10e   : > { %v768_v33 = vadd.f32 %v767_v32, %v747_v31  ;;  %v787_v34 = vpop.f32.mrf.mxu2 }
 0x110   : > { %v788_v35 = vadd.f32 %v787_v34, %v768_v33 }
 0x111   : > { %v807_v22 = vpop.f32.mrf.mxu3 }
 0x112   : > { %v808_v36 = vadd.f32 %v807_v22, %v788_v35 }
 0x114   : > { %v827_v38 = vpop.f32.mrf.mxu0 }
 0x115   : > { %v828_v39 = vadd.f32 %v827_v38, %v808_v36 }
 0x116   : > { %v847_v40 = vpop.f32.mrf.mxu1 }
 0x117   : > { %v848_v42 = vadd.f32 %v847_v40, %v828_v39 }
 0x11a   : > { %v867_v43 = vpop.f32.mrf.mxu2 }
 0x11b   : > { %v868_v45 = vadd.f32 %v867_v43, %v848_v42 }
 0x11c   : > { %v887_v46 = vpop.f32.mrf.mxu3 }
 0x11d   : > { %v888_v47 = vadd.f32 %v887_v46, %v868_v45 }
 0x11f   : > { %v892_v51 = vrot.slane %v888_v47, 6 }
 0x121   : > { %v894_v53 = vsel %vm893_vm0, %v728_v49, %v892_v51 }
 0x122   : > { %v896_v55 = vadd.f32 %v894_v53, %v548_v50 }
 0x124   : > { %897 = vst [vmem:[#allocation2] sm:$0xf] %v896_v55 }
 0x12b   : > { %v901_v63 = vld [vmem:[#allocation2] sm:$0xf] }
 0x12c   : > { %v909_v3 = vmul.f32 %v907_v62, %v901_v63 }
 0x12e   : > { %v917_v4 = vadd.f32 %v915_v0, %v909_v3 }
 0x130   : > { %918 = vst [vmem:[%s283_s12] sm:$0xf] %v917_v4 }
 0x131 PF: > { %s14_s17 = sadd.s32 1, %s1088_s17   ;;  %s1469_s15 = smov %s1084_s16 }
 0x132   : > { %p11_p6 = scmp.ge.s32.totalorder %s14_s17, 18   ;;  %s1470_s16 = smov %s1472_s18 }
 0x134   :  { %13 = sbr.rel (!%p11_p6) target bundleno = 2 (0x2), region = 84 }

</bundles_post_ra>
